<compile_context>
chip_gen: v7x
topology: tpu7x:2x2x1
jax: 0.10.0
libtpu: 0.0.40
codegen_flags: <defaults>
</compile_context>

<pallas_src>
import functools

import jax
import jax.numpy as jnp
from jax.experimental import pallas as pl
from jax.experimental.pallas import tpu as pltpu


def _round_up(n, m):
    return ((n + m - 1) // m) * m


def _fold_rows(a, rows=8):
    """(R, C) -> (rows, C) by pairwise (tree) summing aligned row groups.

    R must be a multiple of `rows`. Static, sublane-aligned slices: pure VPU
    adds, no relayout; tree depth log2(R/rows) instead of a serial chain.
    """
    r, _ = a.shape
    parts = [a[g * rows:(g + 1) * rows, :] for g in range(r // rows)]
    while len(parts) > 1:
        nxt = []
        for i in range(0, len(parts) - 1, 2):
            nxt.append(parts[i] + parts[i + 1])
        if len(parts) % 2:
            nxt.append(parts[-1])
        parts = nxt
    return parts[0]


# ---------------------------------------------------------------------------
# Tiled (grid) kernel: grid = (C1/tm, F/tn, C2/tk), contraction (k) innermost.
# ---------------------------------------------------------------------------
def _w_calc_kernel(x_ref, wt_ref, c_ref,   # inputs: x (tm,tn) f32, w^T (tm,tk), centers (tk,tn)
                   t1_ref,                 # output: (8, tn) lane-dense partial sums of (Dx-x)^2
                   acc_ref):               # scratch: (tm, tn) f32 accumulator
    k = pl.program_id(2)
    nk = pl.num_programs(2)

    # Initialize the accumulator to -x: the finalize step is then just
    # square + fold (saves one full (tm,tn) subtract pass per (i,j) tile).
    @pl.when(k == 0)
    def _():
        acc_ref[...] = -x_ref[...]

    # Operands arrive already in the matmul dtype (bf16 by default, cast in the
    # wrapper) -> no per-step VPU convert; MXU accumulates in f32.
    acc_ref[...] += jnp.dot(wt_ref[...], c_ref[...],
                            preferred_element_type=jnp.float32)

    @pl.when(k == nk - 1)
    def _():
        d = acc_ref[...]                      # Dx - x
        t1_ref[...] = _fold_rows(d * d)


# ---------------------------------------------------------------------------
# Single-block fast path: whole padded problem as one VMEM-resident block.
# ---------------------------------------------------------------------------
def _w_calc_single_kernel(x_ref, wt_ref, c_ref, t1_ref):
    d = jnp.dot(wt_ref[...], c_ref[...],
                preferred_element_type=jnp.float32) - x_ref[...]
    t1_ref[...] = _fold_rows(d * d)


def w_calc_loss(x, centers, w, *, p=0.5, lmbd=0.5,
                tm=1024, tn=1024, tk=1024,
                matmul_dtype=jnp.bfloat16, force_grid=False):
    """Pallas wrapper: returns the scalar loss of the w_calc module.

    matmul_dtype controls only the Dx = w^T @ centers operand precision
    (accumulation is always f32); the regularizers T2/T3 are always computed
    in f32 on the original parameter.
    """
    c1, feat = x.shape
    c2 = centers.shape[0]
    assert centers.shape == (c2, feat)
    assert w.shape == (c2, c1)

    op_dtype = jnp.dtype(matmul_dtype)

    # Regularizers hoisted out of the kernel: one cheap fused f32 XLA pass on
    # the original (unpadded, un-rounded) parameter.
    wf = w.astype(jnp.float32)
    t2 = (p * 0.5) * jnp.sqrt(jnp.sum(wf * wf))
    t3 = lmbd * jnp.sum(jnp.abs(wf))

    # Base (8, 128) alignment of the padded problem.
    c1a = _round_up(c1, 8)
    fa = _round_up(feat, 128)
    c2a = _round_up(c2, 128)

    # ---------------- Fast path: whole problem in one VMEM block ------------
    fast_bytes = (c1a * fa * 4                       # x (f32)
                  + c1a * c2a * op_dtype.itemsize    # w^T
                  + c2a * fa * op_dtype.itemsize     # centers
                  + 8 * fa * 4)                      # output partials
    if (not force_grid) and fast_bytes <= (8 << 20):
        # Fused transpose + cast + pad (zeros contribute nothing to the matmul
        # or the squared-error sum; the mean divisor stays the real C1).
        x_p = jnp.pad(x.astype(jnp.float32), ((0, c1a - c1), (0, fa - feat)))
        wt_p = jnp.pad(jnp.transpose(w).astype(op_dtype),
                       ((0, c1a - c1), (0, c2a - c2)))
        c_p = jnp.pad(centers.astype(op_dtype), ((0, c2a - c2), (0, fa - feat)))

        t1_part = pl.pallas_call(
            _w_calc_single_kernel,
            out_shape=jax.ShapeDtypeStruct((8, fa), jnp.float32),
        )(x_p, wt_p, c_p)
        t1 = 0.5 * jnp.sum(t1_part) / c1
        return t1 + t2 + t3

    # ---------------- Tiled path --------------------------------------------
    tm = _round_up(min(tm, c1a), 8)
    tn = _round_up(min(tn, fa), 128)
    tk = _round_up(min(tk, c2a), 128)

    c1p = _round_up(c1, tm)
    fp_ = _round_up(feat, tn)
    c2p = _round_up(c2, tk)
    n_i, n_j, n_k = c1p // tm, fp_ // tn, c2p // tk

    # Fused transpose + cast + pad in the wrapper (single relayout, no
    # in-kernel convert, half the HBM bytes for the re-streamed operands).
    x_p = jnp.pad(x.astype(jnp.float32), ((0, c1p - c1), (0, fp_ - feat)))
    wt_p = jnp.pad(jnp.transpose(w).astype(op_dtype),
                   ((0, c1p - c1), (0, c2p - c2)))
    c_p = jnp.pad(centers.astype(op_dtype), ((0, c2p - c2), (0, fp_ - feat)))

    # VMEM budget: double-buffered input tiles + f32 accumulator + outputs.
    # Cap at 48 MiB so double-buffering stays alive on v7x's 64 MiB VMEM.
    isz = op_dtype.itemsize
    vmem_need = (2 * (tm * tn * 4 + tm * tk * isz + tk * tn * isz)
                 + tm * tn * 4 + 2 * 8 * tn * 4)
    vmem_limit = int(min(max(vmem_need + (8 << 20), 32 << 20), 48 << 20))

    bytes_accessed = (x_p.nbytes                 # x: read once (resident across k)
                      + wt_p.nbytes * n_j        # w^T: re-streamed per F tile
                      + c_p.nbytes * n_i         # centers: re-streamed per C1 tile
                      + n_i * 8 * fp_ * 4)       # T1 partial-sum writeback
    cost = pl.CostEstimate(
        flops=int(2 * c1p * c2p * fp_ + 3 * c1p * fp_),
        transcendentals=0,
        bytes_accessed=int(bytes_accessed),
    )

    t1_part = pl.pallas_call(
        _w_calc_kernel,
        out_shape=jax.ShapeDtypeStruct((n_i * 8, fp_), jnp.float32),
        grid_spec=pltpu.PrefetchScalarGridSpec(
            num_scalar_prefetch=0,
            grid=(n_i, n_j, n_k),
            in_specs=[
                pl.BlockSpec((tm, tn), lambda i, j, k: (i, j)),   # x (f32)
                pl.BlockSpec((tm, tk), lambda i, j, k: (i, k)),   # w^T (op_dtype)
                pl.BlockSpec((tk, tn), lambda i, j, k: (k, j)),   # centers (op_dtype)
            ],
            out_specs=pl.BlockSpec((8, tn), lambda i, j, k: (i, j)),
            scratch_shapes=[pltpu.VMEM((tm, tn), jnp.float32)],
        ),
        compiler_params=pltpu.CompilerParams(
            # Norm work is hoisted, so both i and j are safe to shard across
            # TensorCores (v7x megacore); k is the accumulation axis.
            dimension_semantics=("parallel", "parallel", "arbitrary"),
            vmem_limit_bytes=vmem_limit,
        ),
        cost_estimate=cost,
    )(x_p, wt_p, c_p)

    t1 = 0.5 * jnp.sum(t1_part) / c1
    return t1 + t2 + t3


def w_calc_loss_ref(x, centers, w, *, p=0.5, lmbd=0.5, matmul_dtype=jnp.float32):
    """Pure-JAX reference. matmul_dtype lets us mirror the kernel's MXU precision."""
    dx = jnp.dot(w.T.astype(matmul_dtype), centers.astype(matmul_dtype),
                 preferred_element_type=jnp.float32)              # (C1, F)
    xf = x.astype(jnp.float32)
    t1 = 0.5 * jnp.mean(jnp.sum((dx - xf) ** 2, axis=-1))
    wf = w.astype(jnp.float32)
    t2 = (p * 0.5) * jnp.sqrt(jnp.sum(wf * wf))
    t3 = lmbd * jnp.sum(jnp.abs(wf))
    return t1 + t2 + t3


if __name__ == "__main__":
    # Small shapes consistent with the module (galFea rows, centers rows, feat
    # dim), deliberately non-tile-aligned so padding is exercised.
    num_classes1 = 24     # rows of x (gallery features)
    num_classes2 = 200    # rows of centers (contraction dim)
    feat_dim = 160
    p, lmbd = 0.5, 0.5

    key = jax.random.PRNGKey(0)
    kx, kc, kw = jax.random.split(key, 3)
    x = jax.random.normal(kx, (num_classes1, feat_dim), dtype=jnp.float32)
    centers = jax.random.normal(kc, (num_classes2, feat_dim), dtype=jnp.float32)
    # Deterministic init of the nn.Parameter w ~ randn(num_classes2, num_classes1)
    w = jax.random.normal(kw, (num_classes2, num_classes1), dtype=jnp.float32)

    ref_bf16 = w_calc_loss_ref(x, centers, w, p=p, lmbd=lmbd,
                               matmul_dtype=jnp.bfloat16)
    ref_f32 = w_calc_loss_ref(x, centers, w, p=p, lmbd=lmbd,
                              matmul_dtype=jnp.float32)

    # 1) Single-block fast path (default): the whole padded problem fits VMEM.
    loss_fast = jax.block_until_ready(w_calc_loss(x, centers, w, p=p, lmbd=lmbd))
    assert jnp.allclose(loss_fast, ref_bf16, rtol=1e-4, atol=1e-2), (loss_fast, ref_bf16)
    assert jnp.allclose(loss_fast, ref_f32, rtol=3e-2, atol=1.0), (loss_fast, ref_f32)

    # 2) Tiled grid path: tiny tiles + force_grid so the full (2, 2, 2) grid
    #    (init, accumulate, revisit, finalize) actually runs at these shapes.
    loss_grid = jax.block_until_ready(
        w_calc_loss(x, centers, w, p=p, lmbd=lmbd,
                    tm=16, tn=128, tk=128, force_grid=True))
    assert jnp.allclose(loss_grid, ref_bf16, rtol=1e-4, atol=1e-2), (loss_grid, ref_bf16)
    assert jnp.allclose(loss_grid, ref_f32, rtol=3e-2, atol=1.0), (loss_grid, ref_f32)

    # 3) f32-operand grid path (exercises the no-cast wrapper branch); loose
    #    tolerance since default-precision f32 matmuls may use bf16 passes.
    loss_f32 = jax.block_until_ready(
        w_calc_loss(x, centers, w, p=p, lmbd=lmbd,
                    tm=16, tn=128, tk=128, force_grid=True,
                    matmul_dtype=jnp.float32))
    assert jnp.allclose(loss_f32, ref_f32, rtol=2e-2, atol=1.0), (loss_f32, ref_f32)

    print("KERNEL_OK")
</pallas_src>

<mosaic_0001>
module attributes {stable_mosaic.version = 11 : i64} {
  func.func @_w_calc_single_kernel(%arg0: memref<24x256xf32, #tpu.memory_space<vmem>>, %arg1: memref<24x256xbf16, #tpu.memory_space<vmem>>, %arg2: memref<256x256xbf16, #tpu.memory_space<vmem>>, %arg3: memref<8x256xf32, #tpu.memory_space<vmem>>) attributes {dimension_semantics = [], scalar_prefetch = 0 : i64, scratch_operands = 0 : i64, tpu.core_type = #tpu.core_type<tc>} {
    %c0 = arith.constant 0 : index
    %c0_0 = arith.constant 0 : index
    %0 = vector.load %arg1[%c0, %c0_0] : memref<24x256xbf16, #tpu.memory_space<vmem>>, vector<24x256xbf16>
    %c0_1 = arith.constant 0 : index
    %c0_2 = arith.constant 0 : index
    %1 = vector.load %arg2[%c0_1, %c0_2] : memref<256x256xbf16, #tpu.memory_space<vmem>>, vector<256x256xbf16>
    %cst = arith.constant dense<0.000000e+00> : vector<24x256xf32>
    %2 = tpu.matmul %0, %1, %cst {dimension_numbers = #tpu.dot_dimension_numbers<[1], [0], [0], [1], [0, 0, 1, 1], [], []>} : vector<24x256xbf16>, vector<256x256xbf16>, vector<24x256xf32> -> vector<24x256xf32>
    %c0_3 = arith.constant 0 : index
    %c0_4 = arith.constant 0 : index
    %3 = vector.load %arg0[%c0_3, %c0_4] : memref<24x256xf32, #tpu.memory_space<vmem>>, vector<24x256xf32>
    %4 = arith.subf %2, %3 : vector<24x256xf32>
    %5 = arith.mulf %4, %4 : vector<24x256xf32>
    %6 = vector.extract_strided_slice %5 {offsets = [0, 0], sizes = [8, 256], strides = [1, 1]} : vector<24x256xf32> to vector<8x256xf32>
    %7 = vector.extract_strided_slice %5 {offsets = [8, 0], sizes = [8, 256], strides = [1, 1]} : vector<24x256xf32> to vector<8x256xf32>
    %8 = vector.extract_strided_slice %5 {offsets = [16, 0], sizes = [8, 256], strides = [1, 1]} : vector<24x256xf32> to vector<8x256xf32>
    %9 = arith.addf %6, %7 : vector<8x256xf32>
    %10 = arith.addf %9, %8 : vector<8x256xf32>
    %c0_5 = arith.constant 0 : index
    %c0_6 = arith.constant 0 : index
    %11 = vector.load %arg3[%c0_5, %c0_6] : memref<8x256xf32, #tpu.memory_space<vmem>>, vector<8x256xf32>
    tpu.vector_store %arg3[%c0_5, %c0_6], %10 {strides = array<i32>} : memref<8x256xf32, #tpu.memory_space<vmem>>, vector<8x256xf32>,
    return
  }
}

</mosaic_0001>

<bundles_post_ra>
// kernel: tpu_custom_call.1
= control target key start
LH: loop header
LB: loop body
LE: loop exit
PB: predicated region body
PF: predicated region fallthrough
CT: control target
= control target key end

     0   :  { %8 = vsyncpa [#allocation3], 0  ;;  %s670_s0 = inlined_call_operand.hbm [shape: f32[24,256], index: 0, kind: input, shape index: {}]   ;;  %s671_s1 = inlined_call_operand.hbm [shape: bf16[24,256], index: 1, kind: input, shape index: {}]   ;;  %s672_s2 = inlined_call_operand.hbm [shape: bf16[256,256], index: 2, kind: input, shape index: {}]   ;;  %s673_s3 = inlined_call_operand.hbm [shape: f32[8,256], index: 3, kind: output, shape index: {}]  }
   0x1   :  { %9 = vsyncpa [#allocation6], 0 }
   0x2   :  { %10 = vsyncpa [#allocation4], 0  ;;  %s582_s12 = smov [#allocation5]   ;;  %s488_s16 = scalar_lea.hbm %s671_s1, 384 }
   0x3   :  { %s28_s13 = sshll.u32 %s582_s12, 4  ;;  %p489_p0 = scmp.ne.s32.totalorder %s671_s1, %s488_s16  ;;  %s29_s13 = int_to_ptr.vmem [resolvable:$true] %s28_s13 }
   0x4   :  { %p492_p1 = scmp.lt.u32.totalorder %s488_s16, %s671_s1 }
   0x6   :  { %p494_p2 = pnand %p492_p1, %p489_p0 }
   0x8   :  { %497 = shalt.err (!%p494_p2)
}
   0x9   :  { %s498_s21 = scalar_lea.vmem %s29_s13, 384  ;;  %p503_p4 = scmp.lt.s32.totalorder %s29_s13, %s29_s13 }
   0xa   :  { %p499_p3 = scmp.ne.s32.totalorder %s29_s13, %s498_s21  ;;  %p504_p5 = scmp.lt.s32.totalorder %s498_s21, %s498_s21 }
   0xc   :  { %p505_p6 = por %p504_p5, %p503_p4 }
   0xe   :  { %p506_p7 = pnand %p505_p6, %p499_p3 }
  0x10   :  { %509 = shalt.err (!%p506_p7)
}
  0x11   :  { %s583_s22 = smov 128   ;;  %s584_s23 = smov 8  }
  0x12   :  { %34 = dma.hbm_to_vmem [thread:$0]  %s671_s1, 384, %s29_s13, [#allocation6], %s583_s22, %s583_s22, %s584_s23  }
  0x13   :  { %s585_s26 = smov [#allocation2]   ;;  %s510_s30 = scalar_lea.hbm %s670_s0, 768 }
  0x14   :  { %s16_s27 = sshll.u32 %s585_s26, 4  ;;  %p511_p8 = scmp.ne.s32.totalorder %s670_s0, %s510_s30  ;;  %s17_s27 = int_to_ptr.vmem [resolvable:$true] %s16_s27 }
  0x15   :  { %p514_p9 = scmp.lt.u32.totalorder %s510_s30, %s670_s0 }
  0x17   :  { %p516_p10 = pnand %p514_p9, %p511_p8 }
  0x19   :  { %519 = shalt.err (!%p516_p10)
}
  0x1a   :  { %s520_s8 = scalar_lea.vmem %s17_s27, 768  ;;  %p525_p12 = scmp.lt.s32.totalorder %s17_s27, %s17_s27 }
  0x1b   :  { %p521_p11 = scmp.ne.s32.totalorder %s17_s27, %s520_s8  ;;  %p526_p13 = scmp.lt.s32.totalorder %s520_s8, %s520_s8 }
  0x1d   :  { %p527_p0 = por %p526_p13, %p525_p12 }
  0x1f   :  { %p528_p1 = pnand %p527_p0, %p521_p11 }
  0x21   :  { %531 = shalt.err (!%p528_p1)
}
  0x22   :  { %s586_s1 = smov 256   ;;  %s587_s9 = smov 16  }
  0x23   :  { %22 = dma.hbm_to_vmem [thread:$0]  %s670_s0, 768, %s17_s27, [#allocation3], %s586_s1, %s586_s1, %s587_s9  }
  0x24   :  { %s588_s12 = smov [#allocation7]   ;;  %s532_s16 = scalar_lea.hbm %s672_s2, 4096 }
  0x25   :  { %s40_s13 = sshll.u32 %s588_s12, 4  ;;  %p533_p2 = scmp.ne.s32.totalorder %s672_s2, %s532_s16  ;;  %s41_s13 = int_to_ptr.vmem [resolvable:$true] %s40_s13 }
  0x26   :  { %p536_p3 = scmp.lt.u32.totalorder %s532_s16, %s672_s2 }
  0x28   :  { %p538_p4 = pnand %p536_p3, %p533_p2 }
  0x2a   :  { %541 = shalt.err (!%p538_p4)
}
  0x2b   :  { %s542_s21 = scalar_lea.vmem %s41_s13, 4096  ;;  %p547_p6 = scmp.lt.s32.totalorder %s41_s13, %s41_s13 }
  0x2c   :  { %p543_p5 = scmp.ne.s32.totalorder %s41_s13, %s542_s21  ;;  %p548_p7 = scmp.lt.s32.totalorder %s542_s21, %s542_s21 }
  0x2e   :  { %p549_p8 = por %p548_p7, %p547_p6 }
  0x30   :  { %p550_p9 = pnand %p549_p8, %p543_p5 }
  0x32   :  { %553 = shalt.err (!%p550_p9)
}
  0x33   :  { %46 = dma.hbm_to_vmem [thread:$0]  %s672_s2, 4096, %s41_s13, [#allocation6], %s583_s22, %s583_s22, %s584_s23  }
  0x34   :  { %576 = dma.done.wait [#allocation3], 768  }
  0x35   :  { %577 = vsyncadd [#allocation3], 4294966528 }
  0x36   :  { %578 = dma.done.wait [#allocation6], 4480  }
  0x37   :  { %579 = vsyncadd [#allocation6], 4294962816  ;;  %v435_v0 = vld [vmem:[#allocation7 + $0x4] ss:$8 sps:$4 sm:$0xff]   ;;  %v437_v1 = vld [vmem:[#allocation7] ss:$8 sps:$4 sm:$0xff]  }
  0x38   :  { %268 = vmatprep.subr.bf16.mxu0 %v435_v0  ;;  %395 = vmatprep.subr.bf16.mxu1 %v435_v0  ;;  %v438_v2 = vld [vmem:[#allocation7 + $0x14] ss:$8 sps:$4 sm:$0xff]   ;;  %v440_v3 = vld [vmem:[#allocation7 + $0x10] ss:$8 sps:$4 sm:$0xff]   ;;  %v441_v4 = vld [vmem:[#allocation7 + $0x24] ss:$8 sps:$4 sm:$0xff]  }
  0x39   :  { %269 = vmatpush1.bf16.msra.mxu0 %v437_v1  ;;  %411 = vmatpush1.bf16.msra.mxu1 %v437_v1  ;;  %v443_v5 = vld [vmem:[#allocation7 + $0x20] ss:$8 sps:$4 sm:$0xff]   ;;  %v444_v6 = vld [vmem:[#allocation7 + $0x34] ss:$8 sps:$4 sm:$0xff]   ;;  %v446_v7 = vld [vmem:[#allocation7 + $0x30] ss:$8 sps:$4 sm:$0xff]  }
  0x3a   :  { %270 = vmatprep.subr.bf16.mxu0 %v438_v2  ;;  %396 = vmatprep.subr.bf16.mxu1 %v438_v2  ;;  %v447_v8 = vld [vmem:[#allocation7 + $0x44] ss:$8 sps:$4 sm:$0xff]   ;;  %v449_v9 = vld [vmem:[#allocation7 + $0x40] ss:$8 sps:$4 sm:$0xff]   ;;  %v450_v10 = vld [vmem:[#allocation7 + $0x54] ss:$8 sps:$4 sm:$0xff]  }
  0x3b   :  { %v452_v11 = vld [vmem:[#allocation7 + $0x50] ss:$8 sps:$4 sm:$0xff]   ;;  %v453_v12 = vld [vmem:[#allocation7 + $0x64] ss:$8 sps:$4 sm:$0xff]   ;;  %v455_v15 = vld [vmem:[#allocation7 + $0x60] ss:$8 sps:$4 sm:$0xff]  }
  0x3c   :  { %v485_v13 = vld [vmem:[#allocation5 + $0x4] ss:$8 sps:$4 sm:$0xff]   ;;  %v652_v14 = vld [vmem:[#allocation5 + $0x10] sm:$0xff]  ;;  %v461_v20 = vld [vmem:[#allocation7 + $0x80] ss:$8 sps:$4 sm:$0xff]   ;;  %s589_s2 = smov [#allocation8]  }
  0x3d   :  { %271 = vmatpush1.bf16.msra.mxu0 %v440_v3  ;;  %412 = vmatpush1.bf16.msra.mxu1 %v440_v3  ;;  %v362_v16 = vcombine.high %v652_v14, %v652_v14  ;;  %v456_v17 = vld [vmem:[#allocation7 + $0x74] ss:$8 sps:$4 sm:$0xff]   ;;  %v458_v18 = vld [vmem:[#allocation7 + $0x70] ss:$8 sps:$4 sm:$0xff]   ;;  %v459_v19 = vld [vmem:[#allocation7 + $0x84] ss:$8 sps:$4 sm:$0xff]   ;;  %v361_v36 = vcombine.low %v652_v14, %v652_v14 }
  0x3e   :  { %272 = vmatprep.subr.bf16.mxu0 %v441_v4  ;;  %397 = vmatprep.subr.bf16.mxu1 %v441_v4  ;;  %v462_v21 = vld [vmem:[#allocation7 + $0x94] ss:$8 sps:$4 sm:$0xff]   ;;  %v464_v22 = vld [vmem:[#allocation7 + $0x90] ss:$8 sps:$4 sm:$0xff]   ;;  %v465_v23 = vld [vmem:[#allocation7 + $0xa4] ss:$8 sps:$4 sm:$0xff]  }
  0x3f   :  { %300 = vmatprep.mubr.bf16.mxu0 %v485_v13  ;;  %310 = vmatprep.mubr.bf16.mxu1 %v362_v16  ;;  %v467_v24 = vld [vmem:[#allocation7 + $0xa0] ss:$8 sps:$4 sm:$0xff]   ;;  %v468_v25 = vld [vmem:[#allocation7 + $0xb4] ss:$8 sps:$4 sm:$0xff]   ;;  %v470_v26 = vld [vmem:[#allocation7 + $0xb0] ss:$8 sps:$4 sm:$0xff]  }
  0x40   :  { %v471_v27 = vld [vmem:[#allocation7 + $0xc4] ss:$8 sps:$4 sm:$0xff]   ;;  %v473_v28 = vld [vmem:[#allocation7 + $0xc0] ss:$8 sps:$4 sm:$0xff]   ;;  %v474_v29 = vld [vmem:[#allocation7 + $0xd4] ss:$8 sps:$4 sm:$0xff]  }
  0x41   :  { %273 = vmatpush1.bf16.msra.mxu0 %v443_v5  ;;  %413 = vmatpush1.bf16.msra.mxu1 %v443_v5  ;;  %v476_v30 = vld [vmem:[#allocation7 + $0xd0] ss:$8 sps:$4 sm:$0xff]   ;;  %v477_v31 = vld [vmem:[#allocation7 + $0xe4] ss:$8 sps:$4 sm:$0xff]   ;;  %v479_v32 = vld [vmem:[#allocation7 + $0xe0] ss:$8 sps:$4 sm:$0xff]  }
  0x42   :  { %274 = vmatprep.subr.bf16.mxu0 %v444_v6  ;;  %398 = vmatprep.subr.bf16.mxu1 %v444_v6  ;;  %v480_v33 = vld [vmem:[#allocation7 + $0xf4] ss:$8 sps:$4 sm:$0xff]   ;;  %v482_v34 = vld [vmem:[#allocation7 + $0xf0] ss:$8 sps:$4 sm:$0xff]   ;;  %v320_v39 = vld [vmem:[#allocation2 + $0x8] sm:$0xff]  ;;  %s349_s22 = sshll.u32 %s589_s2, 4  ;;  %s350_s22 = int_to_ptr.vmem [resolvable:$true] %s349_s22 }
  0x43   :  { %v483_v35 = vld [vmem:[#allocation5] ss:$8 sps:$4 sm:$0xff]   ;;  %v319_v37 = vld [vmem:[#allocation2] sm:$0xff]  ;;  %v324_v40 = vld [vmem:[#allocation2 + $0x28] sm:$0xff]  ;;  %s554_s23 = scalar_lea.vmem %s350_s22, 256  ;;  %p559_p11 = scmp.lt.s32.totalorder %s350_s22, %s350_s22 }
  0x44   :  { %v323_v38 = vld [vmem:[#allocation2 + $0x20] sm:$0xff]  ;;  %v321_v43 = vld [vmem:[#allocation2 + $0x10] sm:$0xff]  ;;  %v322_v48 = vld [vmem:[#allocation2 + $0x18] sm:$0xff]  ;;  %p555_p10 = scmp.ne.s32.totalorder %s350_s22, %s554_s23  ;;  %p560_p12 = scmp.lt.s32.totalorder %s554_s23, %s554_s23 }
  0x45   :  { %275 = vmatpush1.bf16.msra.mxu0 %v446_v7  ;;  %414 = vmatpush1.bf16.msra.mxu1 %v446_v7 }
  0x46   :  { %276 = vmatprep.subr.bf16.mxu0 %v447_v8  ;;  %399 = vmatprep.subr.bf16.mxu1 %v447_v8  ;;  %p561_p13 = por %p560_p12, %p559_p11 }
  0x48   :  { %p562_p0 = pnand %p561_p13, %p555_p10 }
  0x49   :  { %277 = vmatpush1.bf16.msra.mxu0 %v449_v9  ;;  %415 = vmatpush1.bf16.msra.mxu1 %v449_v9 }
  0x4a   :  { %278 = vmatprep.subr.bf16.mxu0 %v450_v10  ;;  %400 = vmatprep.subr.bf16.mxu1 %v450_v10 }
  0x4d   :  { %279 = vmatpush1.bf16.msra.mxu0 %v452_v11  ;;  %416 = vmatpush1.bf16.msra.mxu1 %v452_v11 }
  0x4e   :  { %280 = vmatprep.subr.bf16.mxu0 %v453_v12  ;;  %401 = vmatprep.subr.bf16.mxu1 %v453_v12 }
  0x51   :  { %281 = vmatpush1.bf16.msra.mxu0 %v455_v15  ;;  %417 = vmatpush1.bf16.msra.mxu1 %v455_v15 }
  0x52   :  { %282 = vmatprep.subr.bf16.mxu0 %v456_v17  ;;  %402 = vmatprep.subr.bf16.mxu1 %v456_v17 }
  0x55   :  { %283 = vmatpush1.bf16.msra.mxu0 %v458_v18  ;;  %418 = vmatpush1.bf16.msra.mxu1 %v458_v18 }
  0x56   :  { %284 = vmatprep.subr.bf16.mxu0 %v459_v19  ;;  %403 = vmatprep.subr.bf16.mxu1 %v459_v19 }
  0x59   :  { %285 = vmatpush1.bf16.msra.mxu0 %v461_v20  ;;  %419 = vmatpush1.bf16.msra.mxu1 %v461_v20 }
  0x5a   :  { %286 = vmatprep.subr.bf16.mxu0 %v462_v21  ;;  %404 = vmatprep.subr.bf16.mxu1 %v462_v21 }
  0x5d   :  { %287 = vmatpush1.bf16.msra.mxu0 %v464_v22  ;;  %420 = vmatpush1.bf16.msra.mxu1 %v464_v22 }
  0x5e   :  { %288 = vmatprep.subr.bf16.mxu0 %v465_v23  ;;  %405 = vmatprep.subr.bf16.mxu1 %v465_v23 }
  0x61   :  { %289 = vmatpush1.bf16.msra.mxu0 %v467_v24  ;;  %421 = vmatpush1.bf16.msra.mxu1 %v467_v24 }
  0x62   :  { %290 = vmatprep.subr.bf16.mxu0 %v468_v25  ;;  %406 = vmatprep.subr.bf16.mxu1 %v468_v25 }
  0x65   :  { %291 = vmatpush1.bf16.msra.mxu0 %v470_v26  ;;  %422 = vmatpush1.bf16.msra.mxu1 %v470_v26 }
  0x66   :  { %292 = vmatprep.subr.bf16.mxu0 %v471_v27  ;;  %407 = vmatprep.subr.bf16.mxu1 %v471_v27 }
  0x69   :  { %293 = vmatpush1.bf16.msra.mxu0 %v473_v28  ;;  %423 = vmatpush1.bf16.msra.mxu1 %v473_v28 }
  0x6a   :  { %294 = vmatprep.subr.bf16.mxu0 %v474_v29  ;;  %408 = vmatprep.subr.bf16.mxu1 %v474_v29 }
  0x6d   :  { %295 = vmatpush1.bf16.msra.mxu0 %v476_v30  ;;  %424 = vmatpush1.bf16.msra.mxu1 %v476_v30 }
  0x6e   :  { %296 = vmatprep.subr.bf16.mxu0 %v477_v31  ;;  %409 = vmatprep.subr.bf16.mxu1 %v477_v31 }
  0x71   :  { %297 = vmatpush1.bf16.msra.mxu0 %v479_v32  ;;  %425 = vmatpush1.bf16.msra.mxu1 %v479_v32 }
  0x72   :  { %298 = vmatprep.subr.bf16.mxu0 %v480_v33  ;;  %410 = vmatprep.subr.bf16.mxu1 %v480_v33 }
  0x75   :  { %299 = vmatpush1.bf16.msra.mxu0 %v482_v34  ;;  %426 = vmatpush1.bf16.msra.mxu1 %v482_v34 }
  0x78   :  { %301 = vmatmul.mubr.bf16.vlgmr.msra.gmra.mrb[0].mxu0 %v483_v35  ;;  %311 = vmatmul.mubr.bf16.vlgmr.msra.gmra.mrb[0].mxu1 %v361_v36 }
 0x14b   :  { %v302_v41 = vpop.f32.mrb[0].mxu0  ;;  %v312_v42 = vpop.f32.mrb[0].mxu1 }
 0x14c   :  { %v325_v44 = vsub.f32 %v302_v41, %v319_v37  ;;  %v304_v45 = vpop.f32.mrb[1].mxu0  ;;  %v329_v46 = vsub.f32 %v312_v42, %v323_v38  ;;  %v314_v47 = vpop.f32.mrb[1].mxu1 }
 0x14d   :  { %v326_v49 = vsub.f32 %v304_v45, %v320_v39  ;;  %v306_v50 = vpop.f32.mrb[2].mxu0  ;;  %v330_v51 = vsub.f32 %v314_v47, %v324_v40  ;;  %v316_v52 = vpop.f32.mrb[2].mxu1 }
 0x14e   :  { %v327_v53 = vsub.f32 %v306_v50, %v321_v43  ;;  %v308_v54 = vpop.f32.mrb[3].mxu0  ;;  %v317_v55 = vpop.f32.mrb[3].mxu1  ;;  %v331_v57 = vmul.f32 %v325_v44, %v325_v44  ;;  %v335_v58 = vmul.f32 %v329_v46, %v329_v46 }
 0x14f   :  { %v328_v56 = vsub.f32 %v308_v54, %v322_v48  ;;  %v332_v60 = vmul.f32 %v326_v49, %v326_v49  ;;  %v336_v61 = vmul.f32 %v330_v51, %v330_v51 }
 0x150   :  { %v333_v59 = vmul.f32 %v327_v53, %v327_v53 }
 0x151   :  { %v334_v62 = vmul.f32 %v328_v56, %v328_v56 }
 0x152   :  { %v337_v63 = vadd.f32 %v333_v59, %v331_v57 }
 0x153   :  { %v338_v0 = vadd.f32 %v334_v62, %v332_v60 }
 0x154   :  { %v339_v1 = vadd.f32 %v337_v63, %v335_v58 }
 0x155   :  { %v340_v2 = vadd.f32 %v338_v0, %v336_v61 }
 0x156   :  { %341 = vst [vmem:[#allocation8] sm:$0xff] %v339_v1 }
 0x157   :  { %342 = vst [vmem:[#allocation8 + $0x8] sm:$0xff] %v340_v2 }
 0x158   :  { %565 = shalt.err (!%p562_p0)
}
 0x159   :  { %s566_s27 = scalar_lea.hbm %s673_s3, 256 }
 0x15a   :  { %p567_p1 = scmp.ne.s32.totalorder %s673_s3, %s566_s27  ;;  %p570_p2 = scmp.lt.u32.totalorder %s566_s27, %s673_s3 }
 0x15c   :  { %p572_p3 = pnand %p570_p2, %p567_p1 }
 0x15e   :  { %575 = shalt.err (!%p572_p3)
}
 0x15f   :  { %352 = dma.vmem_to_hbm [thread:$0]  %s350_s22, 256, %s673_s3, [#allocation4]  }
 0x160   :  { %580 = dma.done.wait [#allocation4], 256  }
 0x161   :  { %581 = vsyncadd [#allocation4], 4294967040 }
 0x162   :  { %356 = vsyncpa [#allocation3], 1 }
 0x163   :  { %357 = vsyncpa [#allocation6], 1 }
 0x164   :  { %358 = vsyncpa [#allocation4], 1 }

</bundles_post_ra>
